<compile_context>
chip_gen: v7x
topology: tpu7x:2x2x1
jax: 0.10.0
libtpu: 0.0.40
codegen_flags: <defaults>
</compile_context>

<pallas_src>
import jax
import jax.numpy as jnp
from jax.experimental import pallas as pl
from jax.experimental.pallas import tpu as pltpu


def _round_up(x, m):
    return (x + m - 1) // m * m


def _make_conv_kernel(ksh, ksw, img_w, hw_out):
    """Fused im2col + matmul kernel for one image per grid step."""

    def kernel(w_ref, b_ref, x_ref, o_ref):
        # w_ref: (KH*KW, Cout, Cin) bf16      b_ref: (Cout, 1) f32
        # x_ref: (1, Cin, HWL) bf16 (flat image + zero halo pad)
        # o_ref: (1, Cout, HWp)  (HWp lane-dense, multiple of 128)
        x2 = x_ref[0]                                   # (Cin, HWL)
        cout = o_ref.shape[1]
        acc = jnp.zeros((cout, hw_out), jnp.float32)
        for t in range(ksh * ksw):                      # static unroll, 9 taps
            kh, kw = divmod(t, ksw)
            d = kh * img_w + kw                         # shift in flattened (h, w)
            xs = x2[:, d:d + hw_out]                    # (Cin, HWp) static lane slice
            acc += jnp.dot(w_ref[t], xs, preferred_element_type=jnp.float32)
        o_ref[0] = (acc + b_ref[...]).astype(o_ref.dtype)

    return kernel


def tudui_forward(x_nchw, w_oihw, bias, *, out_dtype=jnp.float32):
    """Equivalent of Tudui.forward: y = Conv2d(3, 64, k=3)(x), NCHW in / NCHW out."""
    n, cin, h, w = x_nchw.shape
    cout, _, ksh, ksw = w_oihw.shape
    hout, wout = h - ksh + 1, w - ksw + 1

    hw = h * w
    hwp = _round_up(hw, 128)                   # lane-dense per-image output width
    halo = (ksh - 1) * w + (ksw - 1)           # max in-kernel shift
    hwl = _round_up(hwp + halo, 128)           # input length incl. zero halo pad

    # ---- wrapper-side glue: bf16 upstream, single cheap tail-pad pass ----
    x_flat = x_nchw.astype(jnp.bfloat16).reshape(n, cin, hw)
    x_flat = jnp.pad(x_flat, ((0, 0), (0, 0), (0, hwl - hw)))

    # (Cout, Cin, KH, KW) -> (KH*KW, Cout, Cin), tap index t = kh*KW + kw.
    w_taps = jnp.transpose(w_oihw, (2, 3, 0, 1)).reshape(ksh * ksw, cout, cin)
    w_taps = w_taps.astype(jnp.bfloat16)
    b_col = bias.reshape(cout, 1).astype(jnp.float32)

    kernel = _make_conv_kernel(ksh, ksw, w, hwp)

    flops = 2 * n * cout * cin * ksh * ksw * hwp
    bytes_accessed = (x_flat.size * 2 + w_taps.size * 2 + b_col.size * 4
                      + n * cout * hwp * jnp.dtype(out_dtype).itemsize)

    out = pl.pallas_call(
        kernel,
        out_shape=jax.ShapeDtypeStruct((n, cout, hwp), out_dtype),
        grid=(n,),
        in_specs=[
            pl.BlockSpec((ksh * ksw, cout, cin), lambda i: (0, 0, 0)),  # weights, resident
            pl.BlockSpec((cout, 1), lambda i: (0, 0)),                  # bias, resident
            pl.BlockSpec((1, cin, hwl), lambda i: (i, 0, 0)),           # one image
        ],
        out_specs=pl.BlockSpec((1, cout, hwp), lambda i: (i, 0, 0)),    # NCHW-contiguous
        compiler_params=pltpu.CompilerParams(
            dimension_semantics=("parallel",),       # shard images across TCs (v7x)
            vmem_limit_bytes=32 * 1024 * 1024,
        ),
        cost_estimate=pl.CostEstimate(
            flops=flops, transcendentals=0, bytes_accessed=bytes_accessed),
    )(w_taps, b_col, x_flat)

    # Drop padded / edge-garbage positions: (N, Cout, HWp) -> NCHW valid window.
    out = out[:, :, :hw].reshape(n, cout, h, w)[:, :, :hout, :wout]
    return out.astype(x_nchw.dtype)


def init_params(key, cin=3, cout=64, ksize=3, dtype=jnp.float32):
    # Deterministic init mirroring PyTorch Conv2d defaults: U(-1/sqrt(fan_in), +).
    kw_key, kb_key = jax.random.split(key)
    fan_in = cin * ksize * ksize
    bound = 1.0 / float(jnp.sqrt(float(fan_in)))
    w = jax.random.uniform(kw_key, (cout, cin, ksize, ksize), dtype, -bound, bound)
    b = jax.random.uniform(kb_key, (cout,), dtype, -bound, bound)
    return w, b


if __name__ == "__main__":
    key = jax.random.PRNGKey(0)
    k_x, k_p = jax.random.split(key)
    # NCHW input like PyTorch: batch=2, channels=3 (fixed by conv1), spatial=16.
    x = jax.random.normal(k_x, (2, 3, 16, 16), jnp.float32)
    w, b = init_params(k_p)

    fwd = jax.jit(tudui_forward)
    y = jax.block_until_ready(fwd(x, w, b))
    assert y.shape == (2, 64, 14, 14), y.shape

    # Tight check: f32 reference on bf16-rounded operands (matches kernel numerics:
    # bf16 products are exact in f32, accumulation/bias/output are f32).
    x_bf = x.astype(jnp.bfloat16).astype(jnp.float32)
    w_bf = w.astype(jnp.bfloat16).astype(jnp.float32)
    y_ref_bf = jax.lax.conv_general_dilated(
        x_bf, w_bf, window_strides=(1, 1), padding="VALID",
        dimension_numbers=("NCHW", "OIHW", "NCHW"),
        precision=jax.lax.Precision.HIGHEST,
    ) + b.reshape(1, 64, 1, 1)
    assert jnp.allclose(y, y_ref_bf, rtol=1e-3, atol=1e-3)

    # Loose sanity check against the full-f32 PyTorch-equivalent convolution
    # (tolerance loosened because the kernel feeds bf16 operands to the MXU).
    y_ref = jax.lax.conv_general_dilated(
        x, w, window_strides=(1, 1), padding="VALID",
        dimension_numbers=("NCHW", "OIHW", "NCHW"),
        precision=jax.lax.Precision.HIGHEST,
    ) + b.reshape(1, 64, 1, 1)
    assert jnp.allclose(y, y_ref, rtol=5e-2, atol=5e-2)

    print("KERNEL_OK")
</pallas_src>

<mosaic_0001>
module attributes {stable_mosaic.version = 11 : i64} {
  func.func @kernel(%arg0: i32, %arg1: memref<9x64x3xbf16, #tpu.memory_space<vmem>>, %arg2: memref<64x1xf32, #tpu.memory_space<vmem>>, %arg3: memref<1x3x384xbf16, #tpu.memory_space<vmem>>, %arg4: memref<1x64x256xf32, #tpu.memory_space<vmem>>) attributes {dimension_semantics = [#tpu.dimension_semantics<parallel>], iteration_bounds = array<i64: 2>, scalar_prefetch = 0 : i64, scratch_operands = 0 : i64, tpu.core_type = #tpu.core_type<tc>, window_params = [{pipeline_mode = #tpu.pipeline_mode<synchronous>, transform_indices = @transform_0, window_bounds = array<i64: 9, 64, 3>}, {pipeline_mode = #tpu.pipeline_mode<synchronous>, transform_indices = @transform_1, window_bounds = array<i64: 64, 1>}, {transform_indices = @transform_2, window_bounds = array<i64: 1, 3, 384>}, {transform_indices = @transform_3, window_bounds = array<i64: 1, 64, 256>}]} {
    %c0 = arith.constant 0 : index
    %c0_0 = arith.constant 0 : index
    %c0_1 = arith.constant 0 : index
    %0 = vector.load %arg3[%c0, %c0_0, %c0_1] : memref<1x3x384xbf16, #tpu.memory_space<vmem>>, vector<1x3x384xbf16>
    %1 = vector.shape_cast %0 : vector<1x3x384xbf16> to vector<3x384xbf16>
    %cst = arith.constant 0.000000e+00 : f32
    %2 = vector.broadcast %cst : f32 to vector<64x256xf32>
    %3 = vector.extract_strided_slice %1 {offsets = [0, 0], sizes = [3, 256], strides = [1, 1]} : vector<3x384xbf16> to vector<3x256xbf16>
    %c0_2 = arith.constant 0 : index
    %c0_3 = arith.constant 0 : index
    %c0_4 = arith.constant 0 : index
    %4 = vector.load %arg1[%c0_2, %c0_3, %c0_4] : memref<9x64x3xbf16, #tpu.memory_space<vmem>>, vector<1x64x3xbf16>
    %5 = vector.shape_cast %4 : vector<1x64x3xbf16> to vector<64x3xbf16>
    %cst_5 = arith.constant dense<0.000000e+00> : vector<64x256xf32>
    %6 = tpu.matmul %5, %3, %cst_5 {dimension_numbers = #tpu.dot_dimension_numbers<[1], [0], [0], [1], [0, 0, 1, 1], [], []>} : vector<64x3xbf16>, vector<3x256xbf16>, vector<64x256xf32> -> vector<64x256xf32>
    %7 = arith.addf %2, %6 : vector<64x256xf32>
    %8 = vector.extract_strided_slice %1 {offsets = [0, 1], sizes = [3, 256], strides = [1, 1]} : vector<3x384xbf16> to vector<3x256xbf16>
    %c1 = arith.constant 1 : index
    %c0_6 = arith.constant 0 : index
    %c0_7 = arith.constant 0 : index
    %9 = vector.load %arg1[%c1, %c0_6, %c0_7] : memref<9x64x3xbf16, #tpu.memory_space<vmem>>, vector<1x64x3xbf16>
    %10 = vector.shape_cast %9 : vector<1x64x3xbf16> to vector<64x3xbf16>
    %cst_8 = arith.constant dense<0.000000e+00> : vector<64x256xf32>
    %11 = tpu.matmul %10, %8, %cst_8 {dimension_numbers = #tpu.dot_dimension_numbers<[1], [0], [0], [1], [0, 0, 1, 1], [], []>} : vector<64x3xbf16>, vector<3x256xbf16>, vector<64x256xf32> -> vector<64x256xf32>
    %12 = arith.addf %7, %11 : vector<64x256xf32>
    %13 = vector.extract_strided_slice %1 {offsets = [0, 2], sizes = [3, 256], strides = [1, 1]} : vector<3x384xbf16> to vector<3x256xbf16>
    %c2 = arith.constant 2 : index
    %c0_9 = arith.constant 0 : index
    %c0_10 = arith.constant 0 : index
    %14 = vector.load %arg1[%c2, %c0_9, %c0_10] : memref<9x64x3xbf16, #tpu.memory_space<vmem>>, vector<1x64x3xbf16>
    %15 = vector.shape_cast %14 : vector<1x64x3xbf16> to vector<64x3xbf16>
    %cst_11 = arith.constant dense<0.000000e+00> : vector<64x256xf32>
    %16 = tpu.matmul %15, %13, %cst_11 {dimension_numbers = #tpu.dot_dimension_numbers<[1], [0], [0], [1], [0, 0, 1, 1], [], []>} : vector<64x3xbf16>, vector<3x256xbf16>, vector<64x256xf32> -> vector<64x256xf32>
    %17 = arith.addf %12, %16 : vector<64x256xf32>
    %18 = vector.extract_strided_slice %1 {offsets = [0, 16], sizes = [3, 256], strides = [1, 1]} : vector<3x384xbf16> to vector<3x256xbf16>
    %c3 = arith.constant 3 : index
    %c0_12 = arith.constant 0 : index
    %c0_13 = arith.constant 0 : index
    %19 = vector.load %arg1[%c3, %c0_12, %c0_13] : memref<9x64x3xbf16, #tpu.memory_space<vmem>>, vector<1x64x3xbf16>
    %20 = vector.shape_cast %19 : vector<1x64x3xbf16> to vector<64x3xbf16>
    %cst_14 = arith.constant dense<0.000000e+00> : vector<64x256xf32>
    %21 = tpu.matmul %20, %18, %cst_14 {dimension_numbers = #tpu.dot_dimension_numbers<[1], [0], [0], [1], [0, 0, 1, 1], [], []>} : vector<64x3xbf16>, vector<3x256xbf16>, vector<64x256xf32> -> vector<64x256xf32>
    %22 = arith.addf %17, %21 : vector<64x256xf32>
    %23 = vector.extract_strided_slice %1 {offsets = [0, 17], sizes = [3, 256], strides = [1, 1]} : vector<3x384xbf16> to vector<3x256xbf16>
    %c4 = arith.constant 4 : index
    %c0_15 = arith.constant 0 : index
    %c0_16 = arith.constant 0 : index
    %24 = vector.load %arg1[%c4, %c0_15, %c0_16] : memref<9x64x3xbf16, #tpu.memory_space<vmem>>, vector<1x64x3xbf16>
    %25 = vector.shape_cast %24 : vector<1x64x3xbf16> to vector<64x3xbf16>
    %cst_17 = arith.constant dense<0.000000e+00> : vector<64x256xf32>
    %26 = tpu.matmul %25, %23, %cst_17 {dimension_numbers = #tpu.dot_dimension_numbers<[1], [0], [0], [1], [0, 0, 1, 1], [], []>} : vector<64x3xbf16>, vector<3x256xbf16>, vector<64x256xf32> -> vector<64x256xf32>
    %27 = arith.addf %22, %26 : vector<64x256xf32>
    %28 = vector.extract_strided_slice %1 {offsets = [0, 18], sizes = [3, 256], strides = [1, 1]} : vector<3x384xbf16> to vector<3x256xbf16>
    %c5 = arith.constant 5 : index
    %c0_18 = arith.constant 0 : index
    %c0_19 = arith.constant 0 : index
    %29 = vector.load %arg1[%c5, %c0_18, %c0_19] : memref<9x64x3xbf16, #tpu.memory_space<vmem>>, vector<1x64x3xbf16>
    %30 = vector.shape_cast %29 : vector<1x64x3xbf16> to vector<64x3xbf16>
    %cst_20 = arith.constant dense<0.000000e+00> : vector<64x256xf32>
    %31 = tpu.matmul %30, %28, %cst_20 {dimension_numbers = #tpu.dot_dimension_numbers<[1], [0], [0], [1], [0, 0, 1, 1], [], []>} : vector<64x3xbf16>, vector<3x256xbf16>, vector<64x256xf32> -> vector<64x256xf32>
    %32 = arith.addf %27, %31 : vector<64x256xf32>
    %33 = vector.extract_strided_slice %1 {offsets = [0, 32], sizes = [3, 256], strides = [1, 1]} : vector<3x384xbf16> to vector<3x256xbf16>
    %c6 = arith.constant 6 : index
    %c0_21 = arith.constant 0 : index
    %c0_22 = arith.constant 0 : index
    %34 = vector.load %arg1[%c6, %c0_21, %c0_22] : memref<9x64x3xbf16, #tpu.memory_space<vmem>>, vector<1x64x3xbf16>
    %35 = vector.shape_cast %34 : vector<1x64x3xbf16> to vector<64x3xbf16>
    %cst_23 = arith.constant dense<0.000000e+00> : vector<64x256xf32>
    %36 = tpu.matmul %35, %33, %cst_23 {dimension_numbers = #tpu.dot_dimension_numbers<[1], [0], [0], [1], [0, 0, 1, 1], [], []>} : vector<64x3xbf16>, vector<3x256xbf16>, vector<64x256xf32> -> vector<64x256xf32>
    %37 = arith.addf %32, %36 : vector<64x256xf32>
    %38 = vector.extract_strided_slice %1 {offsets = [0, 33], sizes = [3, 256], strides = [1, 1]} : vector<3x384xbf16> to vector<3x256xbf16>
    %c7 = arith.constant 7 : index
    %c0_24 = arith.constant 0 : index
    %c0_25 = arith.constant 0 : index
    %39 = vector.load %arg1[%c7, %c0_24, %c0_25] : memref<9x64x3xbf16, #tpu.memory_space<vmem>>, vector<1x64x3xbf16>
    %40 = vector.shape_cast %39 : vector<1x64x3xbf16> to vector<64x3xbf16>
    %cst_26 = arith.constant dense<0.000000e+00> : vector<64x256xf32>
    %41 = tpu.matmul %40, %38, %cst_26 {dimension_numbers = #tpu.dot_dimension_numbers<[1], [0], [0], [1], [0, 0, 1, 1], [], []>} : vector<64x3xbf16>, vector<3x256xbf16>, vector<64x256xf32> -> vector<64x256xf32>
    %42 = arith.addf %37, %41 : vector<64x256xf32>
    %43 = vector.extract_strided_slice %1 {offsets = [0, 34], sizes = [3, 256], strides = [1, 1]} : vector<3x384xbf16> to vector<3x256xbf16>
    %c8 = arith.constant 8 : index
    %c0_27 = arith.constant 0 : index
    %c0_28 = arith.constant 0 : index
    %44 = vector.load %arg1[%c8, %c0_27, %c0_28] : memref<9x64x3xbf16, #tpu.memory_space<vmem>>, vector<1x64x3xbf16>
    %45 = vector.shape_cast %44 : vector<1x64x3xbf16> to vector<64x3xbf16>
    %cst_29 = arith.constant dense<0.000000e+00> : vector<64x256xf32>
    %46 = tpu.matmul %45, %43, %cst_29 {dimension_numbers = #tpu.dot_dimension_numbers<[1], [0], [0], [1], [0, 0, 1, 1], [], []>} : vector<64x3xbf16>, vector<3x256xbf16>, vector<64x256xf32> -> vector<64x256xf32>
    %47 = arith.addf %42, %46 : vector<64x256xf32>
    %c0_30 = arith.constant 0 : index
    %c0_31 = arith.constant 0 : index
    %48 = vector.load %arg2[%c0_30, %c0_31] : memref<64x1xf32, #tpu.memory_space<vmem>>, vector<64x1xf32>
    %49 = vector.broadcast %48 : vector<64x1xf32> to vector<64x256xf32>
    %50 = arith.addf %47, %49 : vector<64x256xf32>
    %c0_32 = arith.constant 0 : index
    %c0_33 = arith.constant 0 : index
    %c0_34 = arith.constant 0 : index
    %51 = vector.load %arg4[%c0_32, %c0_33, %c0_34] : memref<1x64x256xf32, #tpu.memory_space<vmem>>, vector<1x64x256xf32>
    %52 = vector.shape_cast %51 : vector<1x64x256xf32> to vector<64x256xf32>
    %53 = vector.shape_cast %50 : vector<64x256xf32> to vector<1x64x256xf32>
    tpu.vector_store %arg4[%c0_32, %c0_33, %c0_34], %53 {strides = array<i32>} : memref<1x64x256xf32, #tpu.memory_space<vmem>>, vector<1x64x256xf32>,
    return
  }
  func.func @transform_0(%arg0: i32) -> (i32, i32, i32) {
    %c0_i32 = arith.constant 0 : i32
    %c0_i32_0 = arith.constant 0 : i32
    %c0_i32_1 = arith.constant 0 : i32
    %c0_i32_2 = arith.constant 0 : i32
    return %c0_i32, %c0_i32_0, %c0_i32_1 : i32, i32, i32
  }
  func.func @transform_1(%arg0: i32) -> (i32, i32) {
    %c0_i32 = arith.constant 0 : i32
    %c0_i32_0 = arith.constant 0 : i32
    %c0_i32_1 = arith.constant 0 : i32
    return %c0_i32, %c0_i32_0 : i32, i32
  }
  func.func @transform_2(%arg0: i32) -> (i32, i32, i32) {
    %c0_i32 = arith.constant 0 : i32
    %c0_i32_0 = arith.constant 0 : i32
    %c0_i32_1 = arith.constant 0 : i32
    return %arg0, %c0_i32, %c0_i32_0 : i32, i32, i32
  }
  func.func @transform_3(%arg0: i32) -> (i32, i32, i32) {
    %c0_i32 = arith.constant 0 : i32
    %c0_i32_0 = arith.constant 0 : i32
    %c0_i32_1 = arith.constant 0 : i32
    return %arg0, %c0_i32, %c0_i32_0 : i32, i32, i32
  }
}

</mosaic_0001>

<bundles_post_ra>
// kernel: tudui_forward.1
= control target key start
LH: loop header
LB: loop body
LE: loop exit
PB: predicated region body
PF: predicated region fallthrough
CT: control target
= control target key end

     0   :  { %s1968_s12 = smov 0   ;;  %s2277_s0 = inlined_call_operand.vmem [shape: bf16[9,64,3], index: 0, kind: input, shape index: {}]   ;;  %s2278_s1 = inlined_call_operand.vmem [shape: f32[64,1], index: 1, kind: input, shape index: {}]   ;;  %s2279_s2 = inlined_call_operand.vmem [shape: bf16[2,3,384], index: 2, kind: input, shape index: {}]   ;;  %s2280_s3 = inlined_call_operand.vmem [shape: f32[2,64,256], index: 3, kind: output, shape index: {}]  }
   0x1 LB: > { %s1593_s13 = sadd.s32 4294967295, %s1935_s12   ;;  %p1597_p0 = scmp.ge.s32.totalorder %s1935_s12, 1  ;;  %s1935_s12 = sphi %s1968_s12, %s13_s12  }
   0x2   : > { %p137_p1 = scmp.lt.s32.totalorder %s1935_s12, 3 }
   0x4   : > { %p138_p2 = pnand %p1597_p0, %p137_p1 }
   0x5   : > { %p161_p3 = scmp.lt.s32.totalorder (!%p138_p2), %s1593_s13, 1  ;;  %v215_v0 = vlaneseq (!%p138_p2)  ;;  %v1937_v1 = vmov (!%p138_p2), 1983009808   ;;  %s1938_s18 = smov (!%p138_p2), 111   ;;  %v1940_v11 = vmov (!%p138_p2), 0   ;;  %vm249_vm0 = vcmask (!%p138_p2), 1040384  }
   0x6   : > { %141 = sbr.rel (%p138_p2) target bundleno = 507 (0x1fb), region = 32  ;;  %v213_v2 = vunpack.c.l.s4 (!%p138_p2), %v1937_v1  ;;  %s1939_s19 = smov (!%p138_p2), 127   ;;  %291 = vmatprep.mubr.bf16.mxu1 (!%p138_p2), %v1940_v11  ;;  %821 = vmatprep.mubr.bf16.mxu0 (!%p138_p2), %v1940_v11  ;;  %vm250_vm1 = vcmask (!%p138_p2), 1041408   ;;  %v1947_v14 = vmov (!%p138_p2), 65535   ;;  %vm768_vm2 = vcmask (!%p138_p2), 908288   ;;  %v1893_v30 = vld [vmem:[%s2277_s0 + $0x20] sm:$0xff] (!%p138_p2)  }
   0x7   : > { %v216_v3 = vshrl.u32 (!%p138_p2), %v215_v0, 7  ;;  %1890 = vset.pattern.permute.xlu0 (!%p138_p2), %v1940_v11  ;;  %1891 = vset.pattern.permute.xlu1 (!%p138_p2), %v1940_v11  ;;  %s1941_s20 = smov (!%p138_p2), 110   ;;  %s1942_s21 = smov (!%p138_p2), 96   ;;  %v251_v15 = vsel (!%p138_p2), %vm249_vm0, 4294967295, %v1947_v14  ;;  %vm233_vm3 = vcmask (!%p138_p2), 1039360   ;;  %vm913_vm4 = vcmask (!%p138_p2), 900096  }
   0x8   : > { %v214_v4 = vunpack.c.0.s8 (!%p138_p2), %v213_v2  ;;  %s1943_s22 = smov (!%p138_p2), 126   ;;  %s1944_s23 = smov (!%p138_p2), 95   ;;  %v2008_v16 = vsel (!%p138_p2), %vm250_vm1, %v251_v15, 0  ;;  %v1894_v31 = vld [vmem:[%s2277_s0 + $0x80] sm:$0xff] (!%p138_p2)   ;;  %vm236_vm5 = vcmask (!%p138_p2), 23552   ;;  %vm1058_vm6 = vcmask (!%p138_p2), 785408  }
   0x9   : > { %s1945_s24 = smov (!%p138_p2), 112   ;;  %s1946_s25 = smov (!%p138_p2), 94   ;;  %v1895_v41 = vld [vmem:[%s2277_s0 + $0x28] sm:$0xff] (!%p138_p2)   ;;  %vm478_vm7 = vcmask (!%p138_p2), 1031168   ;;  %v1458_v47 = vld [vmem:[%s2278_s1] sm:$0xff] (!%p138_p2)  ;;  %v1461_v54 = vld [vmem:[%s2278_s1 + $0x18] sm:$0xff] (!%p138_p2) }
   0xa   : > { %v217_v5 = vsub.s32 (!%p138_p2), %v214_v4, %v216_v3  ;;  %v1896_v42 = vld [vmem:[%s2277_s0 + $0x88] sm:$0xff] (!%p138_p2)   ;;  %v1897_v55 = vld [vmem:[%s2277_s0 + $0x30] sm:$0xff] (!%p138_p2)   ;;  %v1898_v56 = vld [vmem:[%s2277_s0 + $0xa0] sm:$0xff] (!%p138_p2)   ;;  %vm1203_vm8 = vcmask (!%p138_p2), 777216   ;;  %vm623_vm9 = vcmask (!%p138_p2), 916480   ;;  %vm1348_vm10 = vcmask (!%p138_p2), 769024  }
   0xb   : > { %v1459_v48 = vld [vmem:[%s2278_s1 + $0x8] sm:$0xff] (!%p138_p2)  ;;  %v1460_v57 = vld [vmem:[%s2278_s1 + $0x10] sm:$0xff] (!%p138_p2)  ;;  %v1462_v62 = vld [vmem:[%s2278_s1 + $0x20] sm:$0xff] (!%p138_p2) }
   0xc   : > { %v1463_v61 = vld [vmem:[%s2278_s1 + $0x28] sm:$0xff] (!%p138_p2)  ;;  %v1465_v3 = vld [vmem:[%s2278_s1 + $0x38] sm:$0xff] (!%p138_p2) }
   0xd   : > { %s2282_s13 = smov (!%p161_p3, %s1593_s13), 1  ;;  %v1899_v4 = vld [vmem:[%s2277_s0 + $0x38] sm:$0xff]  }
   0xe   : > { %s1870_s14 = smul.u32 6, %s2282_s13 }
  0x10   : > { %s165_s17 = scalar_lea.vmem %s2279_s2, %s1870_s14  ;;  %s1739_s14 = sshll.u32 %s2282_s13, 7 }
  0x11   : > { %v172_v6 = vld [vmem:[%s165_s17] sm:$0x3f]  ;;  %s2256_s17 = scalar_lea.vmem %s2280_s3, %s1739_s14 }
  0x12   : > { %v1982_v7 = vrot.slane %v172_v6, %v217_v5  ;;  %v211_v8 = vcombine.high %v172_v6, %v172_v6  ;;  %v1464_v6 = vld [vmem:[%s2278_s1 + $0x30] sm:$0xff] }
  0x14   : > { %v1986_v9 = vcombine.high %v1982_v7, %v1982_v7  ;;  %v225_v10 = vrot.slane %v211_v8, %v217_v5  ;;  %v365_v34 = vand.u32 %v2008_v16, %v1982_v7  ;;  %v1900_v5 = vld [vmem:[%s2277_s0 + $0xa8] sm:$0xff]  }
  0x16   : > { %764 = vrot.lane.b32.xlu1 %v1986_v9, %s1938_s18  ;;  %229 = vrot.lane.b32.xlu0 %v1986_v9, %s1939_s19  ;;  %v368_v27 = vand.u32 %v2008_v16, %v1986_v9 }
  0x1a   : > { %766 = vrot.lane.b32.xlu1 %v225_v10, %s1938_s18  ;;  %231 = vrot.lane.b32.xlu0 %v225_v10, %s1939_s19 }
  0x1e   : > { %762 = vrot.lane.b32.xlu1 %v1982_v7, %s1938_s18  ;;  %227 = vrot.lane.b32.xlu0 %v1982_v7, %s1939_s19 }
  0x22   : > { %911 = vrot.lane.b32.xlu1 %v225_v10, %s1941_s20  ;;  %909 = vrot.lane.b32.xlu0 %v1986_v9, %s1941_s20 }
  0x26   : > { %907 = vrot.lane.b32.xlu0 %v1982_v7, %s1941_s20  ;;  %1054 = vrot.lane.b32.xlu1 %v1986_v9, %s1942_s21 }
  0x2a   : > { %1056 = vrot.lane.b32.xlu0 %v225_v10, %s1942_s21  ;;  %1052 = vrot.lane.b32.xlu1 %v1982_v7, %s1942_s21 }
  0x2e   : > { %474 = vrot.lane.b32.xlu0 %v1986_v9, %s1943_s22  ;;  %476 = vrot.lane.b32.xlu1 %v225_v10, %s1943_s22 }
  0x32   : > { %472 = vrot.lane.b32.xlu0 %v1982_v7, %s1943_s22  ;;  %1199 = vrot.lane.b32.xlu1 %v1986_v9, %s1944_s23 }
  0x36   : > { %1201 = vrot.lane.b32.xlu0 %v225_v10, %s1944_s23  ;;  %1197 = vrot.lane.b32.xlu1 %v1982_v7, %s1944_s23 }
  0x3a   : > { %619 = vrot.lane.b32.xlu0 %v1986_v9, %s1945_s24  ;;  %621 = vrot.lane.b32.xlu1 %v225_v10, %s1945_s24 }
  0x3e   : > { %617 = vrot.lane.b32.xlu0 %v1982_v7, %s1945_s24  ;;  %1344 = vrot.lane.b32.xlu1 %v1986_v9, %s1946_s25 }
  0x42   : > { %1346 = vrot.lane.b32.xlu0 %v225_v10, %s1946_s25  ;;  %1342 = vrot.lane.b32.xlu1 %v1982_v7, %s1946_s25 }
  0x46   : > { %1468 = vperm.xlu0 %1890, %v1458_v47   ;;  %1473 = vperm.xlu1 %1891, %v1459_v48   ;;  %v1922_v47 = vld [vmem:[%s2277_s0 + $0x100] sm:$0xff]   ;;  %v1923_v48 = vld [vmem:[%s2277_s0 + $0x78] sm:$0xff]  }
  0x4a   : > { %1483 = vperm.xlu0 %1890, %v1461_v54   ;;  %1478 = vperm.xlu1 %1891, %v1460_v57  }
  0x4e   : > { %1493 = vperm.xlu0 %1890, %v1463_v61   ;;  %1488 = vperm.xlu1 %1891, %v1462_v62  }
  0x52   : > { %1503 = vperm.xlu0 %1890, %v1465_v3   ;;  %1498 = vperm.xlu1 %1891, %v1464_v6  }
  0x88   : > { %v765_v12 = vpop.permute.xlu1 %764  ;;  %v230_v13 = vpop.permute.xlu0 %229 }
  0x8c   : > { %v767_v17 = vpop.permute.xlu1 %766  ;;  %v232_v18 = vpop.permute.xlu0 %231 }
  0x8d   : > { %v770_v19 = vsel %vm768_vm2, %v765_v12, %v767_v17  ;;  %v235_v20 = vsel %vm233_vm3, %v230_v13, %v232_v18  ;;  %v1903_v17 = vld [vmem:[%s2277_s0 + $0x8] sm:$0xff]   ;;  %v1904_v18 = vld [vmem:[%s2277_s0 + $0xb8] sm:$0xff]  }
  0x8e   : > { %v2011_v21 = vand.u32 %v770_v19, %v2008_v16  ;;  %v257_v22 = vand.u32 %v2008_v16, %v235_v20 }
  0x90   : > { %789 = vmatprep.subr.bf16.mxu0 %v2011_v21  ;;  %v763_v23 = vpop.permute.xlu1 %762  ;;  %259 = vmatprep.subr.bf16.mxu1 %v257_v22  ;;  %v228_v24 = vpop.permute.xlu0 %227 }
  0x91   : > { %v769_v25 = vsel %vm768_vm2, %v763_v23, %v765_v12  ;;  %v234_v26 = vsel %vm233_vm3, %v228_v24, %v230_v13  ;;  %v1901_v12 = vld [vmem:[%s2277_s0] sm:$0xff]   ;;  %v1902_v13 = vld [vmem:[%s2277_s0 + $0xb0] sm:$0xff]  }
  0x92   : > { %v2018_v28 = vand.u32 %v769_v25, %v2008_v16  ;;  %v254_v29 = vand.u32 %v2008_v16, %v234_v26  ;;  %v1905_v25 = vld [vmem:[%s2277_s0 + $0x10] sm:$0xff]   ;;  %v1906_v26 = vld [vmem:[%s2277_s0 + $0xc0] sm:$0xff]  }
  0x94   : > { %790 = vmatpush1.bf16.msra.mxu0 %v2018_v28  ;;  %v912_v32 = vpop.permute.xlu1 %911  ;;  %260 = vmatpush1.bf16.msra.mxu1 %v254_v29  ;;  %v910_v33 = vpop.permute.xlu0 %909 }
  0x95   : > { %v915_v35 = vsel %vm913_vm4, %v910_v33, %v912_v32  ;;  %370 = vmatprep.subr.bf16.mxu1 %v368_v27 }
  0x96   : > { %v932_v36 = vand.u32 %v915_v35, %v2008_v16 }
  0x97   : > { %1613 = vmatmul.mubr.msk.bf16.vlgmr.msra.gmra.mrb[0].mxu1 %vm236_vm5, %v1893_v30  ;;  %1669 = vmatmul.mubr.msk.bf16.vlgmr.msra.gmra.mrb[0].mxu0 %vm236_vm5, %v1894_v31  ;;  %v1907_v30 = vld [vmem:[%s2277_s0 + $0x18] sm:$0xff]   ;;  %v1908_v31 = vld [vmem:[%s2277_s0 + $0xc8] sm:$0xff]  }
  0x98   : > { %934 = vmatprep.subr.bf16.mxu0 %v932_v36  ;;  %v908_v37 = vpop.permute.xlu0 %907  ;;  %371 = vmatpush1.bf16.msra.mxu1 %v365_v34  ;;  %v1055_v38 = vpop.permute.xlu1 %1054  ;;  %v1910_v34 = vld [vmem:[%s2277_s0 + $0xd0] sm:$0xff]   ;;  %v1911_v36 = vld [vmem:[%s2277_s0 + $0x48] sm:$0xff]  }
  0x99   : > { %v914_v39 = vsel %vm913_vm4, %v908_v37, %v910_v33  ;;  %301 = vmatprep.mubr.bf16.mxu1 %v1940_v11  ;;  %831 = vmatprep.mubr.bf16.mxu0 %v1940_v11  ;;  %v1909_v33 = vld [vmem:[%s2277_s0 + $0x40] sm:$0xff]   ;;  %v1912_v37 = vld [vmem:[%s2277_s0 + $0xd8] sm:$0xff]  }
  0x9a   : > { %v929_v40 = vand.u32 %v914_v39, %v2008_v16  ;;  %v1913_v39 = vld [vmem:[%s2277_s0 + $0x50] sm:$0xff]  }
  0x9c   : > { %935 = vmatpush1.bf16.msra.mxu0 %v929_v40  ;;  %v1057_v43 = vpop.permute.xlu0 %1056  ;;  %v1053_v44 = vpop.permute.xlu1 %1052  ;;  %v1914_v40 = vld [vmem:[%s2277_s0 + $0xe0] sm:$0xff]  }
  0x9d   : > { %v1060_v45 = vsel %vm1058_vm6, %v1055_v38, %v1057_v43  ;;  %v1059_v51 = vsel %vm1058_vm6, %v1053_v44, %v1055_v38  ;;  %v1916_v43 = vld [vmem:[%s2277_s0 + $0xe8] sm:$0xff]   ;;  %v1918_v44 = vld [vmem:[%s2277_s0 + $0xf0] sm:$0xff]  }
  0x9e   : > { %v1077_v46 = vand.u32 %v1060_v45, %v2008_v16  ;;  %v1074_v58 = vand.u32 %v1059_v51, %v2008_v16  ;;  %v1919_v45 = vld [vmem:[%s2277_s0 + $0x68] sm:$0xff]   ;;  %v1926_v51 = vld [vmem:[%s2277_s0 + $0x110] sm:$0xff]  }
  0x9f   : > { %1614 = vmatmul.mubr.msk.bf16.gmra.mrb[4].mxu1 %vm236_vm5, %v1895_v41  ;;  %1670 = vmatmul.mubr.msk.bf16.gmra.mrb[4].mxu0 %vm236_vm5, %v1896_v42  ;;  %v1915_v42 = vld [vmem:[%s2277_s0 + $0x58] sm:$0xff]  }
  0xa0   : > { %311 = vmatprep.mubr.bf16.mxu1 %v1940_v11  ;;  %966 = vmatprep.mubr.bf16.mxu0 %v1940_v11  ;;  %v475_v49 = vpop.permute.xlu0 %474  ;;  %v477_v50 = vpop.permute.xlu1 %476 }
  0xa1   : > { %1079 = vmatprep.subr.bf16.mxu0 %v1077_v46  ;;  %v480_v52 = vsel %vm478_vm7, %v475_v49, %v477_v50  ;;  %v1920_v46 = vld [vmem:[%s2277_s0 + $0xf8] sm:$0xff]   ;;  %v1925_v50 = vld [vmem:[%s2277_s0 + $0x90] sm:$0xff]  }
  0xa2   : > { %v497_v53 = vand.u32 %v480_v52, %v2008_v16  ;;  %v1927_v52 = vld [vmem:[%s2277_s0 + $0x98] sm:$0xff]  }
  0xa4   : > { %v473_v59 = vpop.permute.xlu0 %472  ;;  %499 = vmatprep.subr.bf16.mxu1 %v497_v53  ;;  %v1200_v60 = vpop.permute.xlu1 %1199  ;;  %v1928_v53 = vld [vmem:[%s2277_s0 + $0x118] sm:$0xff]  }
  0xa5   : > { %v479_v8 = vsel %vm478_vm7, %v473_v59, %v475_v49  ;;  %v1924_v49 = vld [vmem:[%s2277_s0 + $0x108] sm:$0xff]  }
  0xa6   : > { %v494_v14 = vand.u32 %v479_v8, %v2008_v16 }
  0xa7   : > { %1615 = vmatmul.mubr.msk.bf16.gmra.mrb[8].mxu1 %vm236_vm5, %v1897_v55  ;;  %1685 = vmatmul.mubr.msk.bf16.vlgmr.msra.gmra.mrb[0].mxu0 %vm236_vm5, %v1898_v56 }
  0xa8   : > { %1080 = vmatpush1.bf16.msra.mxu0 %v1074_v58  ;;  %321 = vmatprep.mubr.bf16.mxu1 %v1940_v11  ;;  %v1202_v63 = vpop.permute.xlu0 %1201  ;;  %v1198_v1 = vpop.permute.xlu1 %1197 }
  0xa9   : > { %976 = vmatprep.mubr.bf16.mxu0 %v1940_v11  ;;  %v1205_v0 = vsel %vm1203_vm8, %v1200_v60, %v1202_v63  ;;  %v1204_v22 = vsel %vm1203_vm8, %v1198_v1, %v1200_v60 }
  0xaa   : > { %v1222_v2 = vand.u32 %v1205_v0, %v2008_v16  ;;  %v1219_v27 = vand.u32 %v1204_v22, %v2008_v16 }
  0xac   : > { %1224 = vmatprep.subr.bf16.mxu0 %v1222_v2  ;;  %v622_v7 = vpop.permute.xlu1 %621  ;;  %v620_v9 = vpop.permute.xlu0 %619 }
  0xad   : > { %v625_v10 = vsel %vm623_vm9, %v620_v9, %v622_v7 }
  0xae   : > { %v642_v15 = vand.u32 %v625_v10, %v2008_v16 }
  0xaf   : > { %1616 = vmatmul.mubr.msk.bf16.gmra.mrb[12].mxu1 %vm236_vm5, %v1899_v4  ;;  %1686 = vmatmul.mubr.msk.bf16.gmra.mrb[4].mxu0 %vm236_vm5, %v1900_v5 }
  0xb0   : > { %402 = vmatprep.mubr.bf16.mxu1 %v1940_v11  ;;  %986 = vmatprep.mubr.bf16.mxu0 %v1940_v11  ;;  %v618_v19 = vpop.permute.xlu0 %617  ;;  %v1345_v23 = vpop.permute.xlu1 %1344 }
  0xb1   : > { %v624_v32 = vsel %vm623_vm9, %v618_v19, %v620_v9 }
  0xb2   : > { %v639_v35 = vand.u32 %v624_v32, %v2008_v16 }
  0xb4   : > { %v1347_v20 = vpop.permute.xlu0 %1346  ;;  %v1343_v38 = vpop.permute.xlu1 %1342 }
  0xb5   : > { %v1350_v24 = vsel %vm1348_vm10, %v1345_v23, %v1347_v20 }
  0xb6   : > { %v1367_v29 = vand.u32 %v1350_v24, %v2008_v16 }
  0xb7   : > { %1621 = vmatmul.mubr.msk.bf16.vlgmr.msra.gmra.mrb[0].mxu1 %vm236_vm5, %v1901_v12  ;;  %1687 = vmatmul.mubr.msk.bf16.gmra.mrb[8].mxu0 %vm236_vm5, %v1902_v13 }
  0xb8   : > { %500 = vmatpush1.bf16.msra.mxu1 %v494_v14  ;;  %412 = vmatprep.mubr.bf16.mxu1 %v1940_v11 }
  0xb9   : > { %996 = vmatprep.mubr.bf16.mxu0 %v1940_v11  ;;  %644 = vmatprep.subr.bf16.mxu1 %v642_v15 }
  0xbf   : > { %1622 = vmatmul.mubr.msk.bf16.gmra.mrb[4].mxu1 %vm236_vm5, %v1903_v17  ;;  %1688 = vmatmul.mubr.msk.bf16.gmra.mrb[12].mxu0 %vm236_vm5, %v1904_v18 }
  0xc0   : > { %422 = vmatprep.mubr.bf16.mxu1 %v1940_v11  ;;  %1111 = vmatprep.mubr.bf16.mxu0 %v1940_v11 }
  0xc5   : > { %v1469_v62 = vpop.permute.xlu0 %1468  ;;  %v1474_v3 = vpop.permute.xlu1 %1473 }
  0xc7   : > { %1623 = vmatmul.mubr.msk.bf16.gmra.mrb[8].mxu1 %vm236_vm5, %v1905_v25  ;;  %1701 = vmatmul.mubr.msk.bf16.vlgmr.msra.gmra.mrb[0].mxu0 %vm236_vm5, %v1906_v26 }
  0xc8   : > { %1225 = vmatpush1.bf16.msra.mxu0 %v1219_v27  ;;  %432 = vmatprep.mubr.bf16.mxu1 %v1940_v11 }
  0xc9   : > { %1121 = vmatprep.mubr.bf16.mxu0 %v1940_v11  ;;  %1369 = vmatprep.subr.bf16.mxu0 %v1367_v29  ;;  %v1479_v13 = vpop.permute.xlu1 %1478  ;;  %v1484_v25 = vpop.permute.xlu0 %1483 }
  0xcd   : > { %v1489_v29 = vpop.permute.xlu1 %1488 }
  0xcf   : > { %1624 = vmatmul.mubr.msk.bf16.gmra.mrb[12].mxu1 %vm236_vm5, %v1907_v30  ;;  %1702 = vmatmul.mubr.msk.bf16.gmra.mrb[4].mxu0 %vm236_vm5, %v1908_v31 }
  0xd0   : > { %531 = vmatprep.mubr.bf16.mxu1 %v1940_v11  ;;  %1131 = vmatprep.mubr.bf16.mxu0 %v1940_v11 }
  0xd7   : > { %1637 = vmatmul.mubr.msk.bf16.vlgmr.msra.gmra.mrb[0].mxu1 %vm236_vm5, %v1909_v33  ;;  %1703 = vmatmul.mubr.msk.bf16.gmra.mrb[8].mxu0 %vm236_vm5, %v1910_v34 }
  0xd8   : > { %645 = vmatpush1.bf16.msra.mxu1 %v639_v35  ;;  %541 = vmatprep.mubr.bf16.mxu1 %v1940_v11 }
  0xd9   : > { %1740 = vmatprep.subr.bf16.mxu1 %v2011_v21  ;;  %1141 = vmatprep.mubr.bf16.mxu0 %v1940_v11  ;;  %v1349_v21 = vsel %vm1348_vm10, %v1343_v38, %v1345_v23 }
  0xda   : > { %v1364_v41 = vand.u32 %v1349_v21, %v2008_v16  ;;  %v1917_v16 = vld [vmem:[%s2277_s0 + $0x60] sm:$0xff]  }
  0xdf   : > { %1638 = vmatmul.mubr.msk.bf16.gmra.mrb[4].mxu1 %vm236_vm5, %v1911_v36  ;;  %1704 = vmatmul.mubr.msk.bf16.gmra.mrb[12].mxu0 %vm236_vm5, %v1912_v37 }
  0xe0   : > { %551 = vmatprep.mubr.bf16.mxu1 %v1940_v11  ;;  %1256 = vmatprep.mubr.bf16.mxu0 %v1940_v11 }
  0xe7   : > { %1639 = vmatmul.mubr.msk.bf16.gmra.mrb[8].mxu1 %vm236_vm5, %v1913_v39  ;;  %1717 = vmatmul.mubr.msk.bf16.vlgmr.msra.gmra.mrb[0].mxu0 %vm236_vm5, %v1914_v40 }
  0xe8   : > { %1370 = vmatpush1.bf16.msra.mxu0 %v1364_v41  ;;  %561 = vmatprep.mubr.bf16.mxu1 %v1940_v11 }
  0xe9   : > { %1266 = vmatprep.mubr.bf16.mxu0 %v1940_v11 }
  0xef   : > { %1640 = vmatmul.mubr.msk.bf16.gmra.mrb[12].mxu1 %vm236_vm5, %v1915_v42  ;;  %1718 = vmatmul.mubr.msk.bf16.gmra.mrb[4].mxu0 %vm236_vm5, %v1916_v43  ;;  %v1494_v42 = vpop.permute.xlu0 %1493 }
  0xf0   : > { %676 = vmatprep.mubr.bf16.mxu1 %v1940_v11  ;;  %1276 = vmatprep.mubr.bf16.mxu0 %v1940_v11 }
  0xf7   : > { %1653 = vmatmul.mubr.msk.bf16.vlgmr.msra.gmra.mrb[0].mxu1 %vm236_vm5, %v1917_v16  ;;  %1719 = vmatmul.mubr.msk.bf16.gmra.mrb[8].mxu0 %vm236_vm5, %v1918_v44 }
  0xf8   : > { %1741 = vmatpush1.bf16.msra.mxu1 %v2018_v28  ;;  %686 = vmatprep.mubr.bf16.mxu1 %v1940_v11  ;;  %v1921_v28 = vld [vmem:[%s2277_s0 + $0x70] sm:$0xff]  }
  0xf9   : > { %1286 = vmatprep.mubr.bf16.mxu0 %v1940_v11 }
  0xff   : > { %1654 = vmatmul.mubr.msk.bf16.gmra.mrb[4].mxu1 %vm236_vm5, %v1919_v45  ;;  %1720 = vmatmul.mubr.msk.bf16.gmra.mrb[12].mxu0 %vm236_vm5, %v1920_v46  ;;  %v1499_v45 = vpop.permute.xlu1 %1498 }
 0x100   : > { %696 = vmatprep.mubr.bf16.mxu1 %v1940_v11  ;;  %1401 = vmatprep.mubr.bf16.mxu0 %v1940_v11 }
 0x107   : > { %1655 = vmatmul.mubr.msk.bf16.gmra.mrb[8].mxu1 %vm236_vm5, %v1921_v28  ;;  %1733 = vmatmul.mubr.msk.bf16.vlgmr.msra.gmra.mrb[0].mxu0 %vm236_vm5, %v1922_v47 }
 0x108   : > { %706 = vmatprep.mubr.bf16.mxu1 %v1940_v11  ;;  %1411 = vmatprep.mubr.bf16.mxu0 %v1940_v11 }
 0x10f   : > { %1656 = vmatmul.mubr.msk.bf16.gmra.mrb[12].mxu1 %vm236_vm5, %v1923_v48  ;;  %1734 = vmatmul.mubr.msk.bf16.gmra.mrb[4].mxu0 %vm236_vm5, %v1924_v49 }
 0x110   : > { %841 = vmatprep.mubr.bf16.mxu1 %v1940_v11  ;;  %1421 = vmatprep.mubr.bf16.mxu0 %v1940_v11 }
 0x117   : > { %1671 = vmatmul.mubr.msk.bf16.vlgmr.msra.gmra.mrb[8].mxu1 %vm236_vm5, %v1925_v50  ;;  %1735 = vmatmul.mubr.msk.bf16.gmra.mrb[8].mxu0 %vm236_vm5, %v1926_v51 }
 0x118   : > { %851 = vmatprep.mubr.bf16.mxu1 %v1940_v11  ;;  %1431 = vmatprep.mubr.bf16.mxu0 %v1940_v11 }
 0x11f   : > { %1672 = vmatmul.mubr.msk.bf16.gmra.mrb[12].mxu1 %vm236_vm5, %v1927_v52  ;;  %1736 = vmatmul.mubr.msk.bf16.gmra.mrb[12].mxu0 %vm236_vm5, %v1928_v53 }
 0x1ca   : > { %v678_v54 = vpop.f32.mrb[0].mxu1 }
 0x1cb   : > { %v680_v55 = vpop.f32.mrb[1].mxu1 }
 0x1cc   : > { %v682_v56 = vpop.f32.mrb[2].mxu1 }
 0x1cd   : > { %v684_v57 = vpop.f32.mrb[3].mxu1 }
 0x1d2   : > { %v688_v58 = vpop.f32.mrb[4].mxu1 }
 0x1d3   : > { %v690_v59 = vpop.f32.mrb[5].mxu1 }
 0x1d4   : > { %v692_v60 = vpop.f32.mrb[6].mxu1 }
 0x1d5   : > { %v694_v11 = vpop.f32.mrb[7].mxu1 }
 0x1da   : > { %v1403_v61 = vpop.f32.mrb[0].mxu0 }
 0x1db   : > { %v1742_v63 = vadd.f32 %v1403_v61, %v678_v54  ;;  %v1405_v0 = vpop.f32.mrb[1].mxu0 }
 0x1dc   : > { %v1743_v1 = vadd.f32 %v1405_v0, %v680_v55  ;;  %v1407_v2 = vpop.f32.mrb[2].mxu0 }
 0x1dd   : > { %v1744_v4 = vadd.f32 %v1407_v2, %v682_v56  ;;  %v1506_v5 = vadd.f32 %v1742_v63, %v1469_v62  ;;  %v1409_v6 = vpop.f32.mrb[3].mxu0 }
 0x1de   : > { %v1507_v7 = vadd.f32 %v1743_v1, %v1469_v62  ;;  %v1745_v8 = vadd.f32 %v1409_v6, %v684_v57  ;;  %v1504_v57 = vpop.permute.xlu0 %1503 }
 0x1df   : > { %1522 = vst [vmem:[%s2256_s17] sm:$0xff] %v1506_v5  ;;  %v1508_v9 = vadd.f32 %v1744_v4, %v1474_v3 }
 0x1e0   : > { %1523 = vst [vmem:[%s2256_s17 + $0x8] sm:$0xff] %v1507_v7  ;;  %v1509_v10 = vadd.f32 %v1745_v8, %v1474_v3 }
 0x1e1   : > { %1524 = vst [vmem:[%s2256_s17 + $0x10] sm:$0xff] %v1508_v9 }
 0x1e2   : > { %1525 = vst [vmem:[%s2256_s17 + $0x18] sm:$0xff] %v1509_v10  ;;  %v1413_v12 = vpop.f32.mrb[4].mxu0 }
 0x1e3   : > { %v1746_v14 = vadd.f32 %v1413_v12, %v688_v58  ;;  %v1415_v15 = vpop.f32.mrb[5].mxu0 }
 0x1e4   : > { %v1747_v17 = vadd.f32 %v1415_v15, %v690_v59  ;;  %v1417_v18 = vpop.f32.mrb[6].mxu0 }
 0x1e5   : > { %v1510_v19 = vadd.f32 %v1746_v14, %v1479_v13  ;;  %v1748_v20 = vadd.f32 %v1417_v18, %v692_v60  ;;  %v1419_v22 = vpop.f32.mrb[7].mxu0 }
 0x1e6   : > { %v1511_v23 = vadd.f32 %v1747_v17, %v1479_v13  ;;  %v1749_v24 = vadd.f32 %v1419_v22, %v694_v11 }
 0x1e7   : > { %1526 = vst [vmem:[%s2256_s17 + $0x20] sm:$0xff] %v1510_v19  ;;  %v1512_v26 = vadd.f32 %v1748_v20, %v1484_v25 }
 0x1e8   : > { %1527 = vst [vmem:[%s2256_s17 + $0x28] sm:$0xff] %v1511_v23  ;;  %v1513_v27 = vadd.f32 %v1749_v24, %v1484_v25 }
 0x1e9   : > { %1528 = vst [vmem:[%s2256_s17 + $0x30] sm:$0xff] %v1512_v26 }
 0x1ea   : > { %1529 = vst [vmem:[%s2256_s17 + $0x38] sm:$0xff] %v1513_v27  ;;  %v843_v30 = vpop.f32.mrb[8].mxu1  ;;  %v1423_v31 = vpop.f32.mrb[8].mxu0 }
 0x1eb   : > { %v1750_v32 = vadd.f32 %v1423_v31, %v843_v30  ;;  %v845_v33 = vpop.f32.mrb[9].mxu1  ;;  %v1425_v34 = vpop.f32.mrb[9].mxu0 }
 0x1ec   : > { %v1751_v35 = vadd.f32 %v1425_v34, %v845_v33  ;;  %v847_v36 = vpop.f32.mrb[10].mxu1  ;;  %v1427_v37 = vpop.f32.mrb[10].mxu0 }
 0x1ed   : > { %v1514_v38 = vadd.f32 %v1750_v32, %v1489_v29  ;;  %v1752_v21 = vadd.f32 %v1427_v37, %v847_v36  ;;  %v849_v39 = vpop.f32.mrb[11].mxu1  ;;  %v1429_v40 = vpop.f32.mrb[11].mxu0 }
 0x1ee   : > { %v1515_v41 = vadd.f32 %v1751_v35, %v1489_v29  ;;  %v1753_v43 = vadd.f32 %v1429_v40, %v849_v39 }
 0x1ef   : > { %1530 = vst [vmem:[%s2256_s17 + $0x40] sm:$0xff] %v1514_v38  ;;  %v1516_v16 = vadd.f32 %v1752_v21, %v1494_v42 }
 0x1f0   : > { %1531 = vst [vmem:[%s2256_s17 + $0x48] sm:$0xff] %v1515_v41  ;;  %v1517_v44 = vadd.f32 %v1753_v43, %v1494_v42 }
 0x1f1   : > { %1532 = vst [vmem:[%s2256_s17 + $0x50] sm:$0xff] %v1516_v16 }
 0x1f2   : > { %1533 = vst [vmem:[%s2256_s17 + $0x58] sm:$0xff] %v1517_v44  ;;  %v853_v46 = vpop.f32.mrb[12].mxu1  ;;  %v1433_v28 = vpop.f32.mrb[12].mxu0 }
 0x1f3   : > { %v1754_v47 = vadd.f32 %v1433_v28, %v853_v46  ;;  %v855_v48 = vpop.f32.mrb[13].mxu1  ;;  %v1435_v49 = vpop.f32.mrb[13].mxu0 }
 0x1f4   : > { %v1755_v50 = vadd.f32 %v1435_v49, %v855_v48  ;;  %v857_v51 = vpop.f32.mrb[14].mxu1  ;;  %v1437_v52 = vpop.f32.mrb[14].mxu0 }
 0x1f5   : > { %v1518_v53 = vadd.f32 %v1754_v47, %v1499_v45  ;;  %v1756_v54 = vadd.f32 %v1437_v52, %v857_v51  ;;  %v859_v55 = vpop.f32.mrb[15].mxu1  ;;  %v1439_v56 = vpop.f32.mrb[15].mxu0 }
 0x1f6   : > { %v1519_v58 = vadd.f32 %v1755_v50, %v1499_v45  ;;  %v1757_v59 = vadd.f32 %v1439_v56, %v859_v55 }
 0x1f7   : > { %1534 = vst [vmem:[%s2256_s17 + $0x60] sm:$0xff] %v1518_v53  ;;  %v1520_v60 = vadd.f32 %v1756_v54, %v1504_v57 }
 0x1f8   : > { %1535 = vst [vmem:[%s2256_s17 + $0x68] sm:$0xff] %v1519_v58  ;;  %v1521_v11 = vadd.f32 %v1757_v59, %v1504_v57 }
 0x1f9   : > { %1536 = vst [vmem:[%s2256_s17 + $0x70] sm:$0xff] %v1520_v60 }
 0x1fa   : > { %1537 = vst [vmem:[%s2256_s17 + $0x78] sm:$0xff] %v1521_v11 }
 0x1fb PF: > { %s13_s12 = sadd.s32 1, %s1935_s12  }
 0x1fc   : > { %p10_p4 = scmp.ge.s32.totalorder %s13_s12, 4  }
 0x1fe   :  { %12 = sbr.rel (!%p10_p4) target bundleno = 1 (0x1), region = 70 }

</bundles_post_ra>
